<compile_context>
chip_gen: v5e
topology: v5e:2x2
jax: 0.10.0
libtpu: 0.0.40
codegen_flags: <defaults>
</compile_context>

<pallas_src>
import jax
import jax.numpy as jnp
from jax.experimental import pallas as pl
from jax.experimental.pallas import tpu as pltpu


def _round_up(x, m):
    return ((x + m - 1) // m) * m


def _make_linear_kernel(num_layers):
    """Kernel: o = sum_l x_l @ W_l  (+ b on last K step)."""

    def kernel(*refs):
        x_refs = refs[:num_layers]
        w_ref, b_ref, o_ref, acc_ref = refs[num_layers:]
        k = pl.program_id(2)

        @pl.when(k == 0)
        def _():
            acc_ref[...] = jnp.zeros_like(acc_ref)

        acc = acc_ref[...]
        for l in range(num_layers):  # static unroll: fused "concat" over layers
            acc = acc + jnp.dot(
                x_refs[l][...], w_ref[l], preferred_element_type=jnp.float32
            )
        acc_ref[...] = acc

        @pl.when(k == pl.num_programs(2) - 1)
        def _():
            o_ref[...] = (acc_ref[...] + b_ref[...]).astype(o_ref.dtype)

    return kernel


def fused_concat_linear(xs, w3, b2, out_dtype=None):
    """Padded result of concat(xs, -1) @ W.T + b as a tiled Pallas matmul.

    xs : list of (B, F_in) per-layer activations.
    w3 : (L, F_in_pad, F_out_pad) layer-split, transposed, zero-padded weight.
    b2 : (1, F_out_pad) zero-padded bias.
    Returns (M_pad, F_out_pad); the caller slices [:B, :F_out].
    """
    L = len(xs)
    B, F_in = xs[0].shape
    _, F_in_pad, F_out_pad = w3.shape
    out_dtype = out_dtype or xs[0].dtype

    # ---- tile sizes (lane-dense, MXU/VMEM friendly on v5e/v6e/v7x) ----------
    tm = min(256, _round_up(B, 8))
    M_pad = _round_up(B, tm)
    tk = min(512, F_in_pad)        # F_in_pad is a multiple of 128
    tn = min(256, F_out_pad)       # F_out_pad is a multiple of 128

    # Pad activations (zero rows/cols contribute nothing to the matmul).
    def _pad(x):
        pm, pk = M_pad - B, F_in_pad - F_in
        if pm or pk:
            x = jnp.pad(x, ((0, pm), (0, pk)))
        return x

    xs = [_pad(x) for x in xs]

    grid = (M_pad // tm, F_out_pad // tn, F_in_pad // tk)

    # Scoped-VMEM budget: double-buffered inputs/outputs + f32 accumulator.
    isz = jnp.dtype(xs[0].dtype).itemsize
    osz = jnp.dtype(out_dtype).itemsize
    vmem_req = (
        2 * (L * tm * tk + L * tk * tn + tn) * isz
        + 2 * tm * tn * osz
        + tm * tn * 4
    )
    vmem_limit = min(max(2 * vmem_req + (2 << 20), 16 << 20), 48 << 20)

    in_specs = (
        [pl.BlockSpec((tm, tk), lambda i, j, k: (i, k)) for _ in range(L)]
        + [
            pl.BlockSpec((L, tk, tn), lambda i, j, k: (0, k, j)),
            pl.BlockSpec((1, tn), lambda i, j, k: (0, j)),
        ]
    )

    return pl.pallas_call(
        _make_linear_kernel(L),
        out_shape=jax.ShapeDtypeStruct((M_pad, F_out_pad), out_dtype),
        grid=grid,
        in_specs=in_specs,
        out_specs=pl.BlockSpec((tm, tn), lambda i, j, k: (i, j)),
        scratch_shapes=[pltpu.VMEM((tm, tn), jnp.float32)],
        compiler_params=pltpu.CompilerParams(
            dimension_semantics=("parallel", "parallel", "arbitrary"),
            vmem_limit_bytes=int(vmem_limit),
        ),
    )(*xs, w3, b2)


class Classifier:
    """JAX/Pallas port of the PyTorch Classifier module (concat + Linear path)."""

    def __init__(self, in_features, out_features, num_layers=1, attn=False, key=None):
        self.multi = num_layers > 1
        self.num_layers = num_layers if self.multi else 1
        # TODO(synk): MergeLinearAttention (attn=True branch) not available.
        self.attn = None
        self.in_features = in_features
        self.out_features = out_features

        total_in = in_features * num_layers if self.multi else in_features
        if key is None:
            key = jax.random.PRNGKey(0)
        kw, kb = jax.random.split(key)
        bound = 1.0 / (total_in ** 0.5)  # matches nn.Linear init (fan_in = total_in)
        # nn.Linear weight stored transposed: (total_in, out_features)
        self.w_t = jax.random.uniform(
            kw, (total_in, out_features), jnp.float32, -bound, bound
        )
        self.b = jax.random.uniform(kb, (out_features,), jnp.float32, -bound, bound)

        # Kernel-friendly layout: layer-split + padded to lane-dense shapes.
        L = self.num_layers
        f_in_pad = _round_up(in_features, 128)
        f_out_pad = _round_up(out_features, 128)
        w3 = self.w_t.reshape(L, in_features, out_features)
        self.w3_pad = jnp.pad(
            w3,
            ((0, 0), (0, f_in_pad - in_features), (0, f_out_pad - out_features)),
        )
        self.b_pad = jnp.pad(self.b, (0, f_out_pad - out_features)).reshape(
            1, f_out_pad
        )

    def __call__(self, *x):
        xs = list(x)
        assert len(xs) == self.num_layers
        B = xs[0].shape[0]
        y = fused_concat_linear(xs, self.w3_pad, self.b_pad)
        return y[:B, : self.out_features]


if __name__ == "__main__":
    key = jax.random.PRNGKey(0)
    k1, k2, kparams = jax.random.split(key, 3)

    batch = 8
    in_features = 32
    num_layers = 2
    out_features = 16

    # Two per-layer feature tensors, as the multi-layer forward(*x) expects.
    x1 = jax.random.normal(k1, (batch, in_features), jnp.float32)
    x2 = jax.random.normal(k2, (batch, in_features), jnp.float32)

    clf = Classifier(
        in_features, out_features, num_layers=num_layers, attn=False, key=kparams
    )

    y = clf(x1, x2)
    jax.block_until_ready(y)

    # Sanity check against a pure-JAX reference (unpadded weights).
    ref = jnp.concatenate([x1, x2], axis=-1) @ clf.w_t + clf.b
    assert y.shape == (batch, out_features)
    assert jnp.allclose(y, ref, atol=1e-4, rtol=1e-4)

    print("KERNEL_OK")
</pallas_src>

<mosaic_0001>
module attributes {stable_mosaic.version = 11 : i64} {
  func.func @kernel(%arg0: i32, %arg1: i32, %arg2: i32, %arg3: memref<8x128xf32, #tpu.memory_space<vmem>>, %arg4: memref<8x128xf32, #tpu.memory_space<vmem>>, %arg5: memref<2x128x128xf32, #tpu.memory_space<vmem>>, %arg6: memref<1x128xf32, #tpu.memory_space<vmem>>, %arg7: memref<8x128xf32, #tpu.memory_space<vmem>>, %arg8: memref<8x128xf32, #tpu.memory_space<vmem>>) attributes {dimension_semantics = [#tpu.dimension_semantics<parallel>, #tpu.dimension_semantics<parallel>, #tpu.dimension_semantics<arbitrary>], iteration_bounds = array<i64: 1, 1, 1>, scalar_prefetch = 0 : i64, scratch_operands = 1 : i64, tpu.core_type = #tpu.core_type<tc>, window_params = [{transform_indices = @transform_0, window_bounds = array<i64: 8, 128>}, {transform_indices = @transform_1, window_bounds = array<i64: 8, 128>}, {transform_indices = @transform_2, window_bounds = array<i64: 2, 128, 128>}, {transform_indices = @transform_3, window_bounds = array<i64: 1, 128>}, {transform_indices = @transform_4, window_bounds = array<i64: 8, 128>}]} {
    %c0_i32 = arith.constant 0 : i32
    %0 = arith.cmpi eq, %arg2, %c0_i32 : i32
    %1 = arith.extui %0 : i1 to i32
    %c0_i32_0 = arith.constant 0 : i32
    %2 = arith.cmpi ne, %1, %c0_i32_0 : i32
    scf.if %2 {
      %cst_16 = arith.constant 0.000000e+00 : f32
      %18 = vector.broadcast %cst_16 : f32 to vector<8x128xf32>
      %c0_17 = arith.constant 0 : index
      %c0_18 = arith.constant 0 : index
      %19 = vector.load %arg8[%c0_17, %c0_18] : memref<8x128xf32, #tpu.memory_space<vmem>>, vector<8x128xf32>
      tpu.vector_store %arg8[%c0_17, %c0_18], %18 {strides = array<i32>} : memref<8x128xf32, #tpu.memory_space<vmem>>, vector<8x128xf32>,
    } else {
    }
    %c0 = arith.constant 0 : index
    %c0_1 = arith.constant 0 : index
    %3 = vector.load %arg8[%c0, %c0_1] : memref<8x128xf32, #tpu.memory_space<vmem>>, vector<8x128xf32>
    %c0_2 = arith.constant 0 : index
    %c0_3 = arith.constant 0 : index
    %4 = vector.load %arg3[%c0_2, %c0_3] : memref<8x128xf32, #tpu.memory_space<vmem>>, vector<8x128xf32>
    %c0_4 = arith.constant 0 : index
    %c0_5 = arith.constant 0 : index
    %c0_6 = arith.constant 0 : index
    %5 = vector.load %arg5[%c0_4, %c0_5, %c0_6] : memref<2x128x128xf32, #tpu.memory_space<vmem>>, vector<1x128x128xf32>
    %6 = vector.shape_cast %5 : vector<1x128x128xf32> to vector<128x128xf32>
    %cst = arith.constant dense<0.000000e+00> : vector<8x128xf32>
    %7 = tpu.matmul %4, %6, %cst {dimension_numbers = #tpu.dot_dimension_numbers<[1], [0], [0], [1], [0, 0, 1, 1], [], []>} : vector<8x128xf32>, vector<128x128xf32>, vector<8x128xf32> -> vector<8x128xf32>
    %8 = arith.addf %3, %7 : vector<8x128xf32>
    %c0_7 = arith.constant 0 : index
    %c0_8 = arith.constant 0 : index
    %9 = vector.load %arg4[%c0_7, %c0_8] : memref<8x128xf32, #tpu.memory_space<vmem>>, vector<8x128xf32>
    %c1 = arith.constant 1 : index
    %c0_9 = arith.constant 0 : index
    %c0_10 = arith.constant 0 : index
    %10 = vector.load %arg5[%c1, %c0_9, %c0_10] : memref<2x128x128xf32, #tpu.memory_space<vmem>>, vector<1x128x128xf32>
    %11 = vector.shape_cast %10 : vector<1x128x128xf32> to vector<128x128xf32>
    %cst_11 = arith.constant dense<0.000000e+00> : vector<8x128xf32>
    %12 = tpu.matmul %9, %11, %cst_11 {dimension_numbers = #tpu.dot_dimension_numbers<[1], [0], [0], [1], [0, 0, 1, 1], [], []>} : vector<8x128xf32>, vector<128x128xf32>, vector<8x128xf32> -> vector<8x128xf32>
    %13 = arith.addf %8, %12 : vector<8x128xf32>
    %c0_12 = arith.constant 0 : index
    %c0_13 = arith.constant 0 : index
    %14 = vector.load %arg8[%c0_12, %c0_13] : memref<8x128xf32, #tpu.memory_space<vmem>>, vector<8x128xf32>
    tpu.vector_store %arg8[%c0_12, %c0_13], %13 {strides = array<i32>} : memref<8x128xf32, #tpu.memory_space<vmem>>, vector<8x128xf32>,
    %c0_i32_14 = arith.constant 0 : i32
    %15 = arith.cmpi eq, %arg2, %c0_i32_14 : i32
    %16 = arith.extui %15 : i1 to i32
    %c0_i32_15 = arith.constant 0 : i32
    %17 = arith.cmpi ne, %16, %c0_i32_15 : i32
    scf.if %17 {
      %c0_16 = arith.constant 0 : index
      %c0_17 = arith.constant 0 : index
      %18 = vector.load %arg8[%c0_16, %c0_17] : memref<8x128xf32, #tpu.memory_space<vmem>>, vector<8x128xf32>
      %c0_18 = arith.constant 0 : index
      %c0_19 = arith.constant 0 : index
      %19 = vector.load %arg6[%c0_18, %c0_19] : memref<1x128xf32, #tpu.memory_space<vmem>>, vector<1x128xf32>
      %20 = vector.broadcast %19 : vector<1x128xf32> to vector<8x128xf32>
      %21 = arith.addf %18, %20 : vector<8x128xf32>
      %c0_20 = arith.constant 0 : index
      %c0_21 = arith.constant 0 : index
      %22 = vector.load %arg7[%c0_20, %c0_21] : memref<8x128xf32, #tpu.memory_space<vmem>>, vector<8x128xf32>
      tpu.vector_store %arg7[%c0_20, %c0_21], %21 {strides = array<i32>} : memref<8x128xf32, #tpu.memory_space<vmem>>, vector<8x128xf32>,
    } else {
    }
    return
  }
  func.func @transform_0(%arg0: i32, %arg1: i32, %arg2: i32) -> (i32, i32) {
    %c0_i32 = arith.constant 0 : i32
    return %arg0, %arg2 : i32, i32
  }
  func.func @transform_1(%arg0: i32, %arg1: i32, %arg2: i32) -> (i32, i32) {
    %c0_i32 = arith.constant 0 : i32
    return %arg0, %arg2 : i32, i32
  }
  func.func @transform_2(%arg0: i32, %arg1: i32, %arg2: i32) -> (i32, i32, i32) {
    %c0_i32 = arith.constant 0 : i32
    %c0_i32_0 = arith.constant 0 : i32
    return %c0_i32, %arg2, %arg1 : i32, i32, i32
  }
  func.func @transform_3(%arg0: i32, %arg1: i32, %arg2: i32) -> (i32, i32) {
    %c0_i32 = arith.constant 0 : i32
    %c0_i32_0 = arith.constant 0 : i32
    return %c0_i32, %arg1 : i32, i32
  }
  func.func @transform_4(%arg0: i32, %arg1: i32, %arg2: i32) -> (i32, i32) {
    %c0_i32 = arith.constant 0 : i32
    return %arg0, %arg1 : i32, i32
  }
}

</mosaic_0001>

<bundles_post_ra>
// kernel: tpu_custom_call.1
= control target key start
LH: loop header
LB: loop body
LE: loop exit
PB: predicated region body
PF: predicated region fallthrough
CT: control target
= control target key end

     0   :  { %9 = vsyncpa [#allocation4], 0  ;;  %s328_s0 = inlined_call_operand.hbm [shape: f32[8,128], index: 0, kind: input, shape index: {}]   ;;  %s329_s1 = inlined_call_operand.hbm [shape: f32[8,128], index: 1, kind: input, shape index: {}]   ;;  %s330_s2 = inlined_call_operand.hbm [shape: f32[2,128,128], index: 2, kind: input, shape index: {}]   ;;  %s331_s3 = inlined_call_operand.vmem [shape: f32[1,128], index: 3, kind: input, shape index: {}]   ;;  %s332_s4 = inlined_call_operand.hbm [shape: f32[8,128], index: 4, kind: output, shape index: {}]  }
   0x1   :  { %10 = vsyncpa [#allocation7], 0  ;;  %s28_s17 = sshll.u32 %s329_s1, 4  ;;  %s29_s17 = int_to_ptr.hbm [resolvable:$true] %s28_s17 }
   0x2   :  { %11 = vsyncpa [#allocation5], 0  ;;  %s282_s18 = smov [#allocation6]   ;;  %s17_s22 = sshll.u32 %s328_s0, 4  ;;  %s18_s22 = int_to_ptr.hbm [resolvable:$true] %s17_s22 }
   0x3   :  { %s30_s19 = sshll.u32 %s282_s18, 4  ;;  %s283_s23 = smov [#allocation3]   ;;  %s31_s19 = int_to_ptr.vmem [resolvable:$true] %s30_s19 }
   0x4   :  { %33 = dma.hbm_to_vmem [thread:$0]  %s29_s17, 128, %s31_s19, [#allocation7]  }
   0x5   :  { %s19_s24 = sshll.u32 %s283_s23, 4  ;;  %s38_s27 = sshll.u32 %s330_s2, 4  ;;  %s20_s24 = int_to_ptr.vmem [resolvable:$true] %s19_s24  ;;  %s39_s27 = int_to_ptr.hbm [resolvable:$true] %s38_s27 }
   0x6   :  { %22 = dma.hbm_to_vmem [thread:$0]  %s18_s22, 128, %s20_s24, [#allocation4]  }
   0x7   :  { %s284_s1 = smov [#allocation8]   ;;  %s285_s29 = smov 128  }
   0x8   :  { %s40_s28 = sshll.u32 %s284_s1, 4  ;;  %s286_s30 = smov 8   ;;  %s41_s28 = int_to_ptr.vmem [resolvable:$true] %s40_s28 }
   0x9   :  { %46 = dma.hbm_to_vmem [thread:$0]  %s39_s27, 4096, %s41_s28, [#allocation7], %s285_s29, %s285_s29, %s286_s30  }
   0xa   :  { %276 = dma.done.wait [#allocation4], 128  }
   0xb   :  { %277 = vsyncadd [#allocation4], 4294967168 }
   0xc   :  { %278 = dma.done.wait [#allocation7], 4224  }
   0xd   :  { %279 = vsyncadd [#allocation7], 4294963072  ;;  %v83_v0 = vld [vmem:[#allocation8 + $0x78] sm:$0xff]  ;;  %v82_v2 = vld [vmem:[#allocation8 + $0x70] sm:$0xff]  ;;  %s287_s5 = smov [#allocation9]   ;;  %s162_s9 = sshll.u32 %s332_s4, 4  ;;  %s163_s9 = int_to_ptr.hbm [resolvable:$true] %s162_s9 }
   0xe   :  { %v122_v1 = vld [vmem:[#allocation8 + $0xf8] sm:$0xff]  ;;  %84 = vmatpush.msra.mxu0 %v83_v0  ;;  %v121_v3 = vld [vmem:[#allocation8 + $0xf0] sm:$0xff]  ;;  %v81_v4 = vld [vmem:[#allocation8 + $0x68] sm:$0xff]  ;;  %s160_s6 = sshll.u32 %s287_s5, 4  ;;  %s161_s6 = int_to_ptr.vmem [resolvable:$true] %s160_s6 }
   0xf   :  { %123 = vmatpush.msra.mxu1 %v122_v1  ;;  %v120_v5 = vld [vmem:[#allocation8 + $0xe8] sm:$0xff]  ;;  %v80_v6 = vld [vmem:[#allocation8 + $0x60] sm:$0xff]  ;;  %v79_v8 = vld [vmem:[#allocation8 + $0x58] sm:$0xff] }
  0x10   :  { %85 = vmatpush.msra.mxu0 %v82_v2  ;;  %v119_v7 = vld [vmem:[#allocation8 + $0xe0] sm:$0xff]  ;;  %v118_v9 = vld [vmem:[#allocation8 + $0xd8] sm:$0xff]  ;;  %v78_v10 = vld [vmem:[#allocation8 + $0x50] sm:$0xff] }
  0x11   :  { %124 = vmatpush.msra.mxu1 %v121_v3  ;;  %v117_v11 = vld [vmem:[#allocation8 + $0xd0] sm:$0xff]  ;;  %v77_v12 = vld [vmem:[#allocation8 + $0x48] sm:$0xff]  ;;  %v76_v14 = vld [vmem:[#allocation8 + $0x40] sm:$0xff] }
  0x12   :  { %86 = vmatpush.msra.mxu0 %v81_v4  ;;  %v116_v13 = vld [vmem:[#allocation8 + $0xc8] sm:$0xff]  ;;  %v115_v15 = vld [vmem:[#allocation8 + $0xc0] sm:$0xff]  ;;  %v75_v16 = vld [vmem:[#allocation8 + $0x38] sm:$0xff] }
  0x13   :  { %125 = vmatpush.msra.mxu1 %v120_v5  ;;  %v114_v17 = vld [vmem:[#allocation8 + $0xb8] sm:$0xff]  ;;  %v74_v18 = vld [vmem:[#allocation8 + $0x30] sm:$0xff]  ;;  %v73_v20 = vld [vmem:[#allocation8 + $0x28] sm:$0xff] }
  0x14   :  { %87 = vmatpush.msra.mxu0 %v80_v6  ;;  %v113_v19 = vld [vmem:[#allocation8 + $0xb0] sm:$0xff]  ;;  %v112_v21 = vld [vmem:[#allocation8 + $0xa8] sm:$0xff]  ;;  %v72_v22 = vld [vmem:[#allocation8 + $0x20] sm:$0xff] }
  0x15   :  { %126 = vmatpush.msra.mxu1 %v119_v7  ;;  %v111_v23 = vld [vmem:[#allocation8 + $0xa0] sm:$0xff]  ;;  %v71_v24 = vld [vmem:[#allocation8 + $0x18] sm:$0xff]  ;;  %v70_v26 = vld [vmem:[#allocation8 + $0x10] sm:$0xff] }
  0x16   :  { %88 = vmatpush.msra.mxu0 %v79_v8  ;;  %v110_v25 = vld [vmem:[#allocation8 + $0x98] sm:$0xff]  ;;  %v109_v27 = vld [vmem:[#allocation8 + $0x90] sm:$0xff]  ;;  %v69_v28 = vld [vmem:[#allocation8 + $0x8] sm:$0xff] }
  0x17   :  { %127 = vmatpush.msra.mxu1 %v118_v9  ;;  %v108_v29 = vld [vmem:[#allocation8 + $0x88] sm:$0xff]  ;;  %v68_v30 = vld [vmem:[#allocation8] sm:$0xff]  ;;  %v67_v32 = vld [vmem:[#allocation3] sm:$0xff] }
  0x18   :  { %89 = vmatpush.msra.mxu0 %v78_v10  ;;  %v107_v31 = vld [vmem:[#allocation8 + $0x80] sm:$0xff]  ;;  %v105_v33 = vld [vmem:[#allocation6] sm:$0xff]  ;;  %v179_v34 = vld [vmem:[%s331_s3] ss:$0 sm:$0xff] }
  0x19   :  { %128 = vmatpush.msra.mxu1 %v117_v11 }
  0x1a   :  { %90 = vmatpush.msra.mxu0 %v77_v12 }
  0x1b   :  { %129 = vmatpush.msra.mxu1 %v116_v13 }
  0x1c   :  { %91 = vmatpush.msra.mxu0 %v76_v14 }
  0x1d   :  { %130 = vmatpush.msra.mxu1 %v115_v15 }
  0x1e   :  { %92 = vmatpush.msra.mxu0 %v75_v16 }
  0x1f   :  { %131 = vmatpush.msra.mxu1 %v114_v17 }
  0x20   :  { %93 = vmatpush.msra.mxu0 %v74_v18 }
  0x21   :  { %132 = vmatpush.msra.mxu1 %v113_v19 }
  0x22   :  { %94 = vmatpush.msra.mxu0 %v73_v20 }
  0x23   :  { %133 = vmatpush.msra.mxu1 %v112_v21 }
  0x24   :  { %95 = vmatpush.msra.mxu0 %v72_v22 }
  0x25   :  { %134 = vmatpush.msra.mxu1 %v111_v23 }
  0x26   :  { %96 = vmatpush.msra.mxu0 %v71_v24 }
  0x27   :  { %135 = vmatpush.msra.mxu1 %v110_v25 }
  0x28   :  { %97 = vmatpush.msra.mxu0 %v70_v26 }
  0x29   :  { %136 = vmatpush.msra.mxu1 %v109_v27 }
  0x2a   :  { %98 = vmatpush.msra.mxu0 %v69_v28 }
  0x2b   :  { %137 = vmatpush.msra.mxu1 %v108_v29 }
  0x2c   :  { %99 = vmatpush.msra.mxu0 %v68_v30 }
  0x2d   :  { %138 = vmatpush.msra.mxu1 %v107_v31  ;;  %100 = vmatmul.f32.vlgmr.msra.gmra.mxu0 %v67_v32 }
  0x2e   :  { %139 = vmatmul.f32.vlgmr.msra.gmra.mxu1 %v105_v33 }
  0xaa   :  { %v101_v35 = vpop.f32.mrf.mxu0 }
  0xab   :  { %v140_v36 = vpop.f32.mrf.mxu1 }
  0xac   :  { %v143_v37 = vadd.f32 %v140_v36, %v101_v35 }
  0xae   :  { %v153_v38 = vadd.f32 %v179_v34, %v143_v37 }
  0xb0   :  { %154 = vst [vmem:[#allocation9] sm:$0xff] %v153_v38 }
  0xb1   :  { %165 = dma.vmem_to_hbm [thread:$0]  %s161_s6, 128, %s163_s9, [#allocation5]  }
  0xb2   :  { %280 = dma.done.wait [#allocation5], 128  }
  0xb3   :  { %281 = vsyncadd [#allocation5], 4294967168 }
  0xb4   :  { %170 = vsyncpa [#allocation4], 1 }
  0xb5   :  { %171 = vsyncpa [#allocation7], 1 }
  0xb6   :  { %172 = vsyncpa [#allocation5], 1 }

</bundles_post_ra>
